<compile_context>
chip_gen: v6e
topology: v6e:2x2x1
jax: 0.10.0
libtpu: 0.0.40
codegen_flags: <defaults>
</compile_context>

<pallas_src>
import jax
import jax.numpy as jnp
from jax.experimental import pallas as pl
from jax.experimental.pallas import tpu as pltpu


def _round_up(x: int, m: int) -> int:
    return ((x + m - 1) // m) * m


def _qmap_kernel(x_ref, w_ref, b_ref, o_ref, acc_ref):
    """One (tm, tn) output tile, accumulated over the K (feature) grid axis.

    x_ref:   (TM, TK)  VMEM input row/K panel
    w_ref:   (TK, TN)  VMEM weight panel
    b_ref:   (1,  TN)  VMEM bias panel
    o_ref:   (TM, TN)  VMEM output tile
    acc_ref: (TM, TN)  f32 VMEM accumulator scratch
    """
    k = pl.program_id(2)

    @pl.when(k == 0)
    def _():
        acc_ref[...] = jnp.zeros_like(acc_ref)

    acc_ref[...] += jnp.dot(
        x_ref[...], w_ref[...], preferred_element_type=jnp.float32
    )

    @pl.when(k == pl.num_programs(2) - 1)
    def _():
        o_ref[...] = (acc_ref[...] + b_ref[...].astype(jnp.float32)).astype(
            o_ref.dtype
        )


def qmap_forward(x, weight, bias, *, tile_m=None, tile_n=None, tile_k=None):
    """Apply the Qmap linear projection with a Pallas TPU kernel.

    Args:
      x:      (..., S, F) input.
      weight: (F, Q) projection weight.
      bias:   (Q,)   projection bias.
    Returns:
      (..., S, Q) output, same dtype as x.
    """
    F, Q = weight.shape
    assert x.shape[-1] == F
    lead_shape = x.shape[:-1]  # (..., S)
    M = 1
    for d in lead_shape:
        M *= d

    x2d = x.reshape(M, F)
    out_dtype = x.dtype

    # --- lane-dense output: pad Q up to a multiple of 128 with zero columns ---
    LANE = 128
    Qp = max(LANE, _round_up(Q, LANE))
    if Qp != Q:
        weight_p = jnp.pad(weight, ((0, 0), (0, Qp - Q)))
        bias_p = jnp.pad(bias, (0, Qp - Q))
    else:
        weight_p = weight
        bias_p = bias
    b2d = bias_p.reshape(1, Qp)

    # --- tile selection --------------------------------------------------
    # Row tile: large (512) for HBM-roofline, but keep >=2 steps on the
    # parallel M axis so both v7x TensorCores get work and pipelining kicks in.
    if tile_m is None:
        if M >= 1024:
            tile_m = 512
        elif M >= 16:
            tile_m = min(512, _round_up(-(-M // 2), 8))
        else:
            tile_m = _round_up(max(M, 1), 8)

    # N tile over the (padded, 128-multiple) output features.
    if tile_n is None:
        if Qp <= 512:
            tile_n = Qp
        elif Qp % 512 == 0:
            tile_n = 512
        elif Qp % 256 == 0:
            tile_n = 256
        else:
            tile_n = 128

    # K tile over input features: full F when small / unaligned, else 128-aligned panels.
    if tile_k is None:
        if F % 128 == 0 and F > 512:
            if F % 512 == 0:
                tile_k = 512
            elif F % 256 == 0:
                tile_k = 256
            else:
                tile_k = 128
        else:
            tile_k = F

    # --- pad M up to a tile multiple (no divisibility assert) -------------
    Mp = _round_up(M, tile_m)
    if Mp != M:
        x2d = jnp.pad(x2d, ((0, Mp - M), (0, 0)))

    grid = (Mp // tile_m, Qp // tile_n, F // tile_k)

    # --- VMEM budget / cost hints -----------------------------------------
    itemsize_x = jnp.dtype(x2d.dtype).itemsize
    itemsize_w = jnp.dtype(weight_p.dtype).itemsize
    itemsize_o = jnp.dtype(out_dtype).itemsize
    est_vmem = (
        2 * (tile_m * tile_k * itemsize_x
             + tile_k * tile_n * itemsize_w
             + tile_n * itemsize_w
             + tile_m * tile_n * itemsize_o)
        + tile_m * tile_n * 4  # f32 accumulator scratch
    )
    vmem_limit = min(64 * 1024 * 1024, max(32 * 1024 * 1024, 2 * est_vmem))

    cost = pl.CostEstimate(
        flops=2 * Mp * F * Qp,
        transcendentals=0,
        bytes_accessed=(Mp * F * itemsize_x
                        + F * Qp * itemsize_w
                        + Qp * itemsize_w
                        + Mp * Qp * itemsize_o),
    )

    out2d = pl.pallas_call(
        _qmap_kernel,
        out_shape=jax.ShapeDtypeStruct((Mp, Qp), out_dtype),
        grid_spec=pltpu.PrefetchScalarGridSpec(
            num_scalar_prefetch=0,
            grid=grid,
            in_specs=[
                pl.BlockSpec((tile_m, tile_k), lambda i, j, k: (i, k)),  # x panel
                pl.BlockSpec((tile_k, tile_n), lambda i, j, k: (k, j)),  # W panel
                pl.BlockSpec((1, tile_n), lambda i, j, k: (0, j)),       # bias panel
            ],
            out_specs=pl.BlockSpec((tile_m, tile_n), lambda i, j, k: (i, j)),
            scratch_shapes=[pltpu.VMEM((tile_m, tile_n), jnp.float32)],
        ),
        compiler_params=pltpu.CompilerParams(
            dimension_semantics=("parallel", "parallel", "arbitrary"),
            vmem_limit_bytes=int(vmem_limit),
        ),
        cost_estimate=cost,
    )(x2d, weight_p, b2d)

    return out2d[:M, :Q].reshape(*lead_shape, Q)


class PallasQmap:
    """Minimal JAX/Pallas analogue of the (concrete, linear) Qmap module."""

    def __init__(self, input_features: int, q_features: int, key, dtype=jnp.float32):
        self.input_features = input_features
        self.q_features = q_features
        kw, kb = jax.random.split(key)
        # Deterministic, nn.Linear-style init scale.
        scale = 1.0 / (input_features ** 0.5)
        self.weight = (
            jax.random.uniform(kw, (input_features, q_features),
                               dtype=jnp.float32, minval=-scale, maxval=scale)
        ).astype(dtype)
        self.bias = (
            jax.random.uniform(kb, (q_features,),
                               dtype=jnp.float32, minval=-scale, maxval=scale)
        ).astype(dtype)

    def __call__(self, x):
        return qmap_forward(x, self.weight, self.bias)


if __name__ == "__main__":
    key = jax.random.PRNGKey(0)
    k_in, k_mod = jax.random.split(key)

    # Small shapes consistent with the (*, S, F) contract.
    batch, seq, in_features, q_features = 2, 8, 32, 32
    x = jax.random.normal(k_in, (batch, seq, in_features), dtype=jnp.float32)

    qmap = PallasQmap(in_features, q_features, k_mod)

    out = qmap(x)
    out = jax.block_until_ready(out)

    # Reference check (plain JAX) to validate kernel semantics.
    ref = x @ qmap.weight + qmap.bias
    assert out.shape == (batch, seq, q_features)
    assert jnp.allclose(out, ref, atol=1e-5, rtol=1e-5)

    print("KERNEL_OK")
</pallas_src>

<mosaic_0001>
module attributes {stable_mosaic.version = 11 : i64} {
  func.func @_qmap_kernel(%arg0: i32, %arg1: i32, %arg2: i32, %arg3: memref<8x32xf32, #tpu.memory_space<vmem>>, %arg4: memref<32x128xf32, #tpu.memory_space<vmem>>, %arg5: memref<1x128xf32, #tpu.memory_space<vmem>>, %arg6: memref<8x128xf32, #tpu.memory_space<vmem>>, %arg7: memref<8x128xf32, #tpu.memory_space<vmem>>) attributes {dimension_semantics = [#tpu.dimension_semantics<parallel>, #tpu.dimension_semantics<parallel>, #tpu.dimension_semantics<arbitrary>], iteration_bounds = array<i64: 2, 1, 1>, scalar_prefetch = 0 : i64, scratch_operands = 1 : i64, tpu.core_type = #tpu.core_type<tc>, window_params = [{transform_indices = @transform_0, window_bounds = array<i64: 8, 32>}, {transform_indices = @transform_1, window_bounds = array<i64: 32, 128>}, {transform_indices = @transform_2, window_bounds = array<i64: 1, 128>}, {transform_indices = @transform_3, window_bounds = array<i64: 8, 128>}]} {
    %c0_i32 = arith.constant 0 : i32
    %0 = arith.cmpi eq, %arg2, %c0_i32 : i32
    %1 = arith.extui %0 : i1 to i32
    %c0_i32_0 = arith.constant 0 : i32
    %2 = arith.cmpi ne, %1, %c0_i32_0 : i32
    scf.if %2 {
      %cst_10 = arith.constant 0.000000e+00 : f32
      %12 = vector.broadcast %cst_10 : f32 to vector<8x128xf32>
      %c0_11 = arith.constant 0 : index
      %c0_12 = arith.constant 0 : index
      %13 = vector.load %arg7[%c0_11, %c0_12] : memref<8x128xf32, #tpu.memory_space<vmem>>, vector<8x128xf32>
      tpu.vector_store %arg7[%c0_11, %c0_12], %12 {strides = array<i32>} : memref<8x128xf32, #tpu.memory_space<vmem>>, vector<8x128xf32>,
    } else {
    }
    %c0 = arith.constant 0 : index
    %c0_1 = arith.constant 0 : index
    %3 = vector.load %arg7[%c0, %c0_1] : memref<8x128xf32, #tpu.memory_space<vmem>>, vector<8x128xf32>
    %c0_2 = arith.constant 0 : index
    %c0_3 = arith.constant 0 : index
    %4 = vector.load %arg3[%c0_2, %c0_3] : memref<8x32xf32, #tpu.memory_space<vmem>>, vector<8x32xf32>
    %c0_4 = arith.constant 0 : index
    %c0_5 = arith.constant 0 : index
    %5 = vector.load %arg4[%c0_4, %c0_5] : memref<32x128xf32, #tpu.memory_space<vmem>>, vector<32x128xf32>
    %cst = arith.constant dense<0.000000e+00> : vector<8x128xf32>
    %6 = tpu.matmul %4, %5, %cst {dimension_numbers = #tpu.dot_dimension_numbers<[1], [0], [0], [1], [0, 0, 1, 1], [], []>} : vector<8x32xf32>, vector<32x128xf32>, vector<8x128xf32> -> vector<8x128xf32>
    %7 = arith.addf %3, %6 : vector<8x128xf32>
    %c0_6 = arith.constant 0 : index
    %c0_7 = arith.constant 0 : index
    %8 = vector.load %arg7[%c0_6, %c0_7] : memref<8x128xf32, #tpu.memory_space<vmem>>, vector<8x128xf32>
    tpu.vector_store %arg7[%c0_6, %c0_7], %7 {strides = array<i32>} : memref<8x128xf32, #tpu.memory_space<vmem>>, vector<8x128xf32>,
    %c0_i32_8 = arith.constant 0 : i32
    %9 = arith.cmpi eq, %arg2, %c0_i32_8 : i32
    %10 = arith.extui %9 : i1 to i32
    %c0_i32_9 = arith.constant 0 : i32
    %11 = arith.cmpi ne, %10, %c0_i32_9 : i32
    scf.if %11 {
      %c0_10 = arith.constant 0 : index
      %c0_11 = arith.constant 0 : index
      %12 = vector.load %arg7[%c0_10, %c0_11] : memref<8x128xf32, #tpu.memory_space<vmem>>, vector<8x128xf32>
      %c0_12 = arith.constant 0 : index
      %c0_13 = arith.constant 0 : index
      %13 = vector.load %arg5[%c0_12, %c0_13] : memref<1x128xf32, #tpu.memory_space<vmem>>, vector<1x128xf32>
      %14 = vector.broadcast %13 : vector<1x128xf32> to vector<8x128xf32>
      %15 = arith.addf %12, %14 : vector<8x128xf32>
      %c0_14 = arith.constant 0 : index
      %c0_15 = arith.constant 0 : index
      %16 = vector.load %arg6[%c0_14, %c0_15] : memref<8x128xf32, #tpu.memory_space<vmem>>, vector<8x128xf32>
      tpu.vector_store %arg6[%c0_14, %c0_15], %15 {strides = array<i32>} : memref<8x128xf32, #tpu.memory_space<vmem>>, vector<8x128xf32>,
    } else {
    }
    return
  }
  func.func @transform_0(%arg0: i32, %arg1: i32, %arg2: i32) -> (i32, i32) {
    %c0_i32 = arith.constant 0 : i32
    return %arg0, %arg2 : i32, i32
  }
  func.func @transform_1(%arg0: i32, %arg1: i32, %arg2: i32) -> (i32, i32) {
    %c0_i32 = arith.constant 0 : i32
    return %arg2, %arg1 : i32, i32
  }
  func.func @transform_2(%arg0: i32, %arg1: i32, %arg2: i32) -> (i32, i32) {
    %c0_i32 = arith.constant 0 : i32
    %c0_i32_0 = arith.constant 0 : i32
    return %c0_i32, %arg1 : i32, i32
  }
  func.func @transform_3(%arg0: i32, %arg1: i32, %arg2: i32) -> (i32, i32) {
    %c0_i32 = arith.constant 0 : i32
    return %arg0, %arg1 : i32, i32
  }
}

</mosaic_0001>

<bundles_post_ra>
// kernel: tpu_custom_call.1
= control target key start
LH: loop header
LB: loop body
LE: loop exit
PB: predicated region body
PF: predicated region fallthrough
CT: control target
= control target key end

     0   :  { %8 = vsyncpa [#allocation4], 0  ;;  %s929_s0 = inlined_call_operand.hbm [shape: f32[16,32], index: 0, kind: input, shape index: {}]   ;;  %s930_s1 = inlined_call_operand.hbm [shape: f32[32,128], index: 1, kind: input, shape index: {}]   ;;  %s931_s2 = inlined_call_operand.vmem [shape: f32[1,128], index: 2, kind: input, shape index: {}]   ;;  %s932_s3 = inlined_call_operand.hbm [shape: f32[16,128], index: 3, kind: output, shape index: {}]  }
   0x1   :  { %10 = vsyncpa [#allocation4 + $0x1], 0 }
   0x2   :  { %11 = vsyncpa [#allocation7], 0 }
   0x3   :  { %12 = vsyncpa [#allocation5], 0 }
   0x4   :  { %14 = vsyncpa [#allocation5 + $0x1], 0  ;;  %s753_s12 = smov 0   ;;  %s755_s13 = smov 0  }
   0x5   :  { %s757_s14 = smov 0   ;;  %s759_s15 = smov 0  }
   0x6   :  { %s761_s16 = smov 0   ;;  %s763_s17 = smov 0  }
   0x7 LB: > { %s475_s18 = sadd.s32 4294967295, %s724_s17   ;;  %s476_s19 = sadd.s32 4294967294, %s724_s17   ;;  %s724_s17 = sphi %s763_s17, %s20_s17   ;;  %s720_s16 = sphi %s761_s16, %s950_s16   ;;  %s716_s15 = sphi %s759_s15, %s949_s15   ;;  %s712_s14 = sphi %s757_s14, %s948_s14   ;;  %s708_s13 = sphi %s755_s13, %s947_s13   ;;  %s704_s12 = sphi %s753_s12, %s946_s12  }
   0x8   : > { %p61_p0 = scmp.ne.s32.totalorder %s708_s13, %s704_s12  ;;  %p787_p1 = scmp.eq.s32.totalorder %s475_s18, 0 }
   0x9   : > { %p791_p2 = scmp.eq.s32.totalorder %s475_s18, 1  ;;  %p147_p3 = scmp.eq.s32.totalorder %s476_s19, 1 }
   0xa   : > { %p797_p4 = por %p787_p1, %p61_p0  ;;  %p477_p5 = scmp.ge.s32.totalorder %s724_s17, 1 }
   0xb   : > { %p802_p6 = por %p147_p3, %p61_p0  ;;  %p154_p7 = scmp.lt.s32.totalorder %s724_s17, 3 }
   0xc   : > { %s936_s22 = scalar_select %p797_p4, 1, 0 }
   0xd   : > { %s937_s23 = scalar_select %p802_p6, 1, 0 }
   0xe   : > { %p807_p8 = pnand %p477_p5, %p154_p7  ;;  %s726_s25 = smov [#allocation6]  }
   0xf   : > { %s170_s26 = sshll.u32 %s726_s25, 4  ;;  %s39_s28 = sadd.s32 1, %s720_s16  ;;  %s171_s26 = int_to_ptr.vmem [resolvable:$true] %s170_s26 }
  0x10   : > { %p517_p9 = pneg %p807_p8  ;;  %s597_s29 = scalar_lea.vmem %s171_s26, 512 }
  0x11   : > { %p598_p13 = scmp.ne.s32.totalorder %s171_s26, %s597_s29  ;;  %p605_p5 = scmp.lt.s32.totalorder %s171_s26, %s171_s26 }
  0x12   : > { %p816_p11 = pnand %p517_p9, %p787_p1  ;;  %p606_p7 = scmp.lt.s32.totalorder %s597_s29, %s597_s29 }
  0x14   : > { %p588_p12 = pneg %p816_p11  ;;  %p607_p6 = por %p606_p7, %p605_p5 }
  0x16   : > { %p600_p0 = pnand %p598_p13, %p588_p12 }
  0x18   : > { %p601_p3 = pneg %p600_p0 }
  0x1a   : > { %p608_p4 = pnand %p607_p6, %p601_p3 }
  0x1c   : > { %611 = shalt.err (!%p608_p4)
}
  0x1d   : > { %s727_s30 = smov 128   ;;  %s728_s4 = smov 8  }
  0x1e   : > { %520 = dma.hbm_to_vmem [thread:$0]  (!%p816_p11), %s930_s1, 512, %s171_s26, [#allocation7], %s727_s30, %s727_s30, %s728_s4  }
  0x1f   : > { %p41_p6 = scmp.ge.s32.totalorder %s39_s28, 2  ;;  %s48_s7 = sadd.s32 1, %s712_s14 }
  0x20   : > { %p55_p4 = scmp.ne.s32.totalorder %s712_s14, %s708_s13  ;;  %p56_p9 = scmp.eq.s32.totalorder %s724_s17, 0 }
  0x21   : > { %s952_s28 = smov (%p41_p6, %s39_s28), 0  ;;  %p530_p0 = scmp.lt.s32.totalorder %s724_s17, 2 }
  0x22   : > { %p834_p12 = por %p56_p9, %p55_p4  ;;  %p840_p13 = por %p791_p2, %p55_p4 }
  0x23   : > { %s43_s10 = ssub.s32 %s720_s16, %s952_s28  ;;  %s190_s11 = sand.u32 1, %s712_s14  }
  0x24   : > { %p46_p11 = scmp.eq.s32.totalorder %s43_s10, 0  ;;  %s481_s18 = sshll.u32 %s190_s11, 3 }
  0x25   : > { %s482_s25 = sshll.u32 %s720_s16, 7  ;;  %s194_s30 = scalar_lea.vmem [#allocation3], %s481_s18 }
  0x26   : > { %s849_s19 = scalar_select %p46_p11, %s712_s14, %s48_s7  }
  0x27   : > { %s200_s29 = scalar_lea.hbm %s929_s0, %s482_s25  ;;  %s202_s4 = sshll.u32 %s194_s30, 4  ;;  %s203_s4 = int_to_ptr.vmem [resolvable:$true] %s202_s4 }
  0x28   : > { %p857_p2 = pnand %p530_p0, %p834_p12  ;;  %s191_s5 = scalar_lea.sflag [#allocation4], %s190_s11 }
  0x29   : > { %s625_s6 = scalar_lea.vmem %s203_s4, 128  ;;  %s729_s7 = smov [#allocation3]  }
  0x2a   : > { %p614_p3 = pneg %p857_p2  ;;  %p626_p5 = scmp.ne.s32.totalorder %s203_s4, %s625_s6 }
  0x2b   : > { %s630_s10 = sshll.u32 %s729_s7, 4  ;;  %s631_s10 = int_to_ptr.vmem [resolvable:$false] %s630_s10 }
  0x2c   : > { %p628_p7 = pnand %p626_p5, %p614_p3  ;;  %s632_s25 = scalar_lea.vmem %s631_s10, 256 }
  0x2d   : > { %p633_p4 = scmp.lt.s32.totalorder %s203_s4, %s631_s10  ;;  %p634_p9 = scmp.lt.s32.totalorder %s632_s25, %s625_s6 }
  0x2e   : > { %p629_p6 = pneg %p628_p7 }
  0x2f   : > { %p635_p11 = por %p634_p9, %p633_p4 }
  0x31   : > { %p636_p10 = pnand %p635_p11, %p629_p6 }
  0x33   : > { %639 = shalt.err (!%p636_p10)
}
  0x34   : > { %524 = dma.hbm_to_vmem [thread:$0]  (!%p857_p2), %s200_s29, 128, %s203_s4, %s191_s5  }
  0x35   : > { %211 = sbr.rel (%p807_p8) target bundleno = 278 (0x116), region = 32  ;;  %s868_s8 = sand.u32 (!%p807_p8), 1, %s708_s13  }
  0x36   : > { %s484_s11 = sshll.u32 (!%p807_p8), %s868_s8, 3  ;;  %s214_s18 = scalar_lea.sflag (!%p807_p8), [#allocation4], %s868_s8 }
  0x37   : > { %s217_s26 = scalar_lea.vmem (!%p807_p8), [#allocation3], %s484_s11  ;;  %p943_p12 = scmp.ne.s32.totalorder (!%p807_p8), %s936_s22, 0 }
  0x3a   : > { %691 = dma.done.wait (%p943_p12), %s214_s18, 128  }
  0x3b   : > { %693 = vsyncadd (%p943_p12), %s214_s18, 4294967168 }
  0x3c   : > { %695 = dma.done.wait (%p787_p1), [#allocation7], 512  }
  0x3d   : > { %697 = vsyncadd (%p787_p1), [#allocation7], 4294966784  ;;  %v730_v0 = vmov 0.0   ;;  %vm731_vm0 = vmmov 0   ;;  %v261_v1 = vld [vmem:[#allocation6 + $0x18] sm:$0xff]  ;;  %v260_v2 = vld [vmem:[#allocation6 + $0x10] sm:$0xff] }
  0x3e   : > { %498 = vmatprep.subr.mxu0 %v730_v0  ;;  %506 = vmatprep.mubr.msk.f32.mxu0 %vm731_vm0, %v730_v0  ;;  %v259_v3 = vld [vmem:[#allocation6 + $0x8] sm:$0xff]  ;;  %v258_v4 = vld [vmem:[#allocation6] sm:$0xff]  ;;  %v257_v5 = vld [vmem:[%s217_s26] sm:$0xff]  ;;  %vm262_vm1 = vcmask 261120   ;;  %s490_s24 = sshll.u32 %s716_s15, 7  ;;  %s246_s27 = scalar_lea.vmem [#allocation8], %s484_s11 }
  0x3f   : > { %499 = vmatpush3.msra.mxu0 %v261_v1  ;;  %v488_v6 = vld [vmem:[%s931_s2] ss:$0 sm:$0xff]  ;;  %s366_s29 = sshll.u32 %s246_s27, 4  ;;  %s887_s21 = scalar_lea.hbm %s932_s3, %s490_s24  ;;  %s367_s29 = int_to_ptr.vmem [resolvable:$true] %s366_s29 }
  0x40   : > { %500 = vmatprep.subr.mxu0 %v730_v0  ;;  %s352_s5 = scalar_lea.sflag [#allocation5], %s868_s8  ;;  %s640_s6 = scalar_lea.vmem %s367_s29, 128 }
  0x41   : > { %501 = vmatpush3.msra.mxu0 %v260_v2  ;;  %p641_p1 = scmp.ne.s32.totalorder %s367_s29, %s640_s6  ;;  %s732_s7 = smov [#allocation8]  }
  0x42   : > { %502 = vmatprep.subr.mxu0 %v730_v0  ;;  %s644_s15 = sshll.u32 %s732_s7, 4  ;;  %s645_s15 = int_to_ptr.vmem [resolvable:$false] %s644_s15 }
  0x43   : > { %503 = vmatpush3.msra.mxu0 %v259_v3  ;;  %p642_p8 = pnand %p641_p1, %p840_p13  ;;  %s646_s10 = scalar_lea.vmem %s645_s15, 256 }
  0x44   : > { %504 = vmatprep.subr.mxu0 %v730_v0  ;;  %p647_p0 = scmp.lt.s32.totalorder %s367_s29, %s645_s15  ;;  %p648_p2 = scmp.lt.s32.totalorder %s646_s10, %s640_s6 }
  0x45   : > { %505 = vmatpush3.msra.mxu0 %v258_v4  ;;  %p643_p10 = pneg %p642_p8 }
  0x46   : > { %507 = vmatmul.mubr.msk.f32.vlgmr.msra.gmra.mxu0 %vm262_vm1, %v257_v5  ;;  %p649_p3 = por %p648_p2, %p647_p0 }
  0x48   : > { %p650_p5 = pnand %p649_p3, %p643_p10 }
 0x106   : > { %v332_v7 = vpop.f32.mrf.mxu0 }
 0x107   : > { %v349_v8 = vadd.f32 %v488_v6, %v332_v7 }
 0x108   : > { %v508_v9 = vpop.f32.mrf.mxu0 }
 0x109   : > { %350 = vst [vmem:[%s246_s27] sm:$0xff] %v349_v8 }
 0x10a   : > { %653 = shalt.err (!%p650_p5)
}
 0x10b   : > { %s654_s25 = scalar_lea.hbm %s887_s21, 128  ;;  %s658_s18 = scalar_lea.hbm %s932_s3, 256 }
 0x10c   : > { %p655_p7 = scmp.ne.s32.totalorder %s887_s21, %s654_s25  ;;  %p659_p9 = scmp.lt.s32.totalorder %s887_s21, %s932_s3 }
 0x10d   : > { %p660_p11 = scmp.lt.s32.totalorder %s658_s18, %s654_s25 }
 0x10e   : > { %p656_p6 = pnand %p655_p7, %p840_p13 }
 0x10f   : > { %p661_p12 = por %p660_p11, %p659_p9 }
 0x110   : > { %p657_p4 = pneg %p656_p6 }
 0x112   : > { %p662_p1 = pnand %p661_p12, %p657_p4 }
 0x114   : > { %665 = shalt.err (!%p662_p1)
}
 0x115   : > { %515 = dma.vmem_to_hbm [thread:$0]  (%p840_p13), %s367_s29, 128, %s887_s21, %s352_s5  }
 0x116 PF: > { %s378_s22 = sand.u32 1, %s704_s12   ;;  %p944_p8 = scmp.ne.s32.totalorder %s937_s23, 0 }
 0x117   : > { %p945_p10 = scmp.ge.s32.totalorder %s724_s17, 2  ;;  %s379_s24 = scalar_lea.sflag [#allocation5], %s378_s22 }
 0x119   : > { %p526_p0 = pnand %p945_p10, %p944_p8 }
 0x11b   : > { %p527_p2 = pneg %p526_p0 }
 0x11d   : > { %699 = dma.done.wait (%p527_p2), %s379_s24, 128  }
 0x11e   : > { %701 = vsyncadd (%p527_p2), %s379_s24, 4294967168  ;;  %s20_s17 = sadd.s32 1, %s724_s17   ;;  %s946_s12 = smov %s708_s13 }
 0x11f   : > { %p17_p3 = scmp.ge.s32.totalorder %s20_s17, 4   ;;  %s947_s13 = smov %s712_s14 }
 0x120   : > { %s948_s14 = smov %s849_s19  ;;  %s949_s15 = smov %s720_s16 }
 0x121   : > { %s950_s16 = smov %s952_s28  ;;  %19 = sbr.rel (!%p17_p3) target bundleno = 7 (0x7), region = 93 }
 0x126   :  { %384 = vsyncpa [#allocation4], 1 }
 0x127   :  { %386 = vsyncpa [#allocation4 + $0x1], 1 }
 0x128   :  { %387 = vsyncpa [#allocation7], 1 }
 0x129   :  { %388 = vsyncpa [#allocation5], 1 }
 0x12a   :  { %390 = vsyncpa [#allocation5 + $0x1], 1 }

</bundles_post_ra>
